<compile_context>
chip_gen: v6e
topology: v6e:2x2x1
jax: 0.10.0
libtpu: 0.0.40
codegen_flags: <defaults>
</compile_context>

<pallas_src>
import jax
import jax.numpy as jnp
from jax.experimental import pallas as pl
from jax.experimental.pallas import tpu as pltpu

# Logical feature sizes and their lane-padded counterparts.
_D_IN = 28 * 28          # 784
_H1, _H1P = 500, 512
_H2, _H2P = 250, 256
_D_OUT, _D_OUTP = 10, 128

_TB = 512                # batch tile (rows per grid step)


def _round_up(x, m):
    return (x + m - 1) // m * m


def _mlp_kernel(x_ref, w1_ref, b1_ref, w2_ref, b2_ref, w3_ref, b3_ref, o_ref):
    # x tile: (TB, 784) bf16.  Weights are bf16, biases f32.  All matmuls
    # accumulate in f32 on the MXU; ReLU/bias math stays in f32.
    x = x_ref[...]

    h1 = jnp.dot(x, w1_ref[...], preferred_element_type=jnp.float32)
    h1 = jnp.maximum(h1 + b1_ref[...], 0.0)                      # relu(fc1), f32

    h2 = jnp.dot(h1.astype(jnp.bfloat16), w2_ref[...],
                 preferred_element_type=jnp.float32)
    h2 = jnp.maximum(h2 + b2_ref[...], 0.0)                      # relu(fc2), f32

    h3 = jnp.dot(h2.astype(jnp.bfloat16), w3_ref[...],
                 preferred_element_type=jnp.float32)
    o_ref[...] = (h3 + b3_ref[...]).astype(o_ref.dtype)          # fc3 (no act)


@jax.jit
def mlp_forward(x, w1p, b1p, w2p, b2p, w3p, b3p):
    """x: (B, 1, 28, 28) or (B, 784).  Params are the *padded* bf16/f32 set
    produced by prepare_params().  Returns (B, 10) f32 logits."""
    xf = x.reshape(-1, _D_IN)
    B = xf.shape[0]

    tb = min(_TB, _round_up(B, 8))          # tile rows (multiple of 8)
    Bp = _round_up(B, tb)                   # padded batch
    xp = xf.astype(jnp.bfloat16)
    if Bp != B:
        xp = jnp.pad(xp, ((0, Bp - B), (0, 0)))

    grid = (Bp // tb,)

    flops = 2 * Bp * (_D_IN * _H1P + _H1P * _H2P + _H2P * _D_OUTP)
    bytes_accessed = (
        Bp * _D_IN * 2                                            # x (bf16)
        + (_D_IN * _H1P + _H1P * _H2P + _H2P * _D_OUTP) * 2       # weights (bf16)
        + (_H1P + _H2P + _D_OUTP) * 4                             # biases (f32)
        + Bp * _D_OUTP * 4                                        # output (f32)
    )

    resident = lambda shape: pl.BlockSpec(shape, lambda i: (0, 0))

    out_padded = pl.pallas_call(
        _mlp_kernel,
        out_shape=jax.ShapeDtypeStruct((Bp, _D_OUTP), jnp.float32),
        grid=grid,
        in_specs=[
            pl.BlockSpec((tb, _D_IN), lambda i: (i, 0)),   # x tile, pipelined
            resident((_D_IN, _H1P)),                       # w1 (resident)
            resident((1, _H1P)),                           # b1
            resident((_H1P, _H2P)),                        # w2
            resident((1, _H2P)),                           # b2
            resident((_H2P, _D_OUTP)),                     # w3
            resident((1, _D_OUTP)),                        # b3
        ],
        out_specs=pl.BlockSpec((tb, _D_OUTP), lambda i: (i, 0)),
        compiler_params=pltpu.CompilerParams(
            dimension_semantics=("parallel",),             # v7x: 2 TCs split batch
        ),
        cost_estimate=pl.CostEstimate(
            flops=flops, transcendentals=0, bytes_accessed=bytes_accessed),
    )(xp, w1p, b1p, w2p, b2p, w3p, b3p)

    return out_padded[:B, :_D_OUT]


def init_params(key):
    """Deterministic init mirroring nn.Linear default: U(-1/sqrt(fan_in), +).
    Logical (unpadded) f32 params, weights stored as (in, out)."""
    def linear(key, fan_in, fan_out):
        kw, kb = jax.random.split(key)
        bound = 1.0 / jnp.sqrt(float(fan_in))
        w = jax.random.uniform(kw, (fan_in, fan_out), jnp.float32, -bound, bound)
        b = jax.random.uniform(kb, (1, fan_out), jnp.float32, -bound, bound)
        return w, b

    k1, k2, k3 = jax.random.split(key, 3)
    w1, b1 = linear(k1, _D_IN, _H1)
    w2, b2 = linear(k2, _H1, _H2)
    w3, b3 = linear(k3, _H2, _D_OUT)
    return w1, b1, w2, b2, w3, b3


def prepare_params(w1, b1, w2, b2, w3, b3):
    """Zero-pad feature dims to lane multiples and cast weights to bf16.
    Padded rows/cols are exactly zero so they never leak into real outputs."""
    def pad_w(w, rows, cols):
        return jnp.pad(w, ((0, rows - w.shape[0]), (0, cols - w.shape[1])))

    def pad_b(b, cols):
        return jnp.pad(b, ((0, 0), (0, cols - b.shape[1])))

    w1p = pad_w(w1, _D_IN, _H1P).astype(jnp.bfloat16)
    w2p = pad_w(w2, _H1P, _H2P).astype(jnp.bfloat16)
    w3p = pad_w(w3, _H2P, _D_OUTP).astype(jnp.bfloat16)
    b1p = pad_b(b1, _H1P).astype(jnp.float32)
    b2p = pad_b(b2, _H2P).astype(jnp.float32)
    b3p = pad_b(b3, _D_OUTP).astype(jnp.float32)
    return w1p, b1p, w2p, b2p, w3p, b3p


def reference_forward_bf16(x, w1, b1, w2, b2, w3, b3):
    """Pure-JAX reference following the exact numeric path of the kernel
    (bf16 MXU inputs, f32 accumulation, f32 bias/ReLU)."""
    xf = x.reshape(-1, _D_IN).astype(jnp.bfloat16)
    h1 = jnp.dot(xf, w1.astype(jnp.bfloat16),
                 preferred_element_type=jnp.float32) + b1
    h1 = jnp.maximum(h1, 0.0)
    h2 = jnp.dot(h1.astype(jnp.bfloat16), w2.astype(jnp.bfloat16),
                 preferred_element_type=jnp.float32) + b2
    h2 = jnp.maximum(h2, 0.0)
    h3 = jnp.dot(h2.astype(jnp.bfloat16), w3.astype(jnp.bfloat16),
                 preferred_element_type=jnp.float32) + b3
    return h3


def reference_forward_f32(x, w1, b1, w2, b2, w3, b3):
    """Full-f32 reference (PyTorch semantics)."""
    xf = x.reshape(-1, _D_IN).astype(jnp.float32)
    h1 = jnp.maximum(xf @ w1 + b1, 0.0)
    h2 = jnp.maximum(h1 @ w2 + b2, 0.0)
    return h2 @ w3 + b3


if __name__ == "__main__":
    key = jax.random.PRNGKey(0)
    kx, kp = jax.random.split(key)

    # Small MNIST-like batch: (B, C=1, H=28, W=28), NCHW.
    B = 8
    x = jax.random.normal(kx, (B, 1, 28, 28), dtype=jnp.float32)

    params = init_params(kp)
    padded_params = prepare_params(*params)

    out = mlp_forward(x, *padded_params)
    out = jax.block_until_ready(out)
    assert out.shape == (B, 10), out.shape

    # Tight check against a reference that follows the kernel's bf16/f32 path.
    ref_bf16 = reference_forward_bf16(x, *params)
    err = float(jnp.max(jnp.abs(out - ref_bf16)))
    assert jnp.allclose(out, ref_bf16, atol=2e-3, rtol=2e-3), err

    # Loose sanity check against the original full-f32 (PyTorch) semantics.
    ref_f32 = reference_forward_f32(x, *params)
    err_f32 = float(jnp.max(jnp.abs(out - ref_f32)))
    assert jnp.allclose(out, ref_f32, atol=1e-1, rtol=1e-1), err_f32

    print("KERNEL_OK")
</pallas_src>

<mosaic_0001>
module attributes {stable_mosaic.version = 11 : i64} {
  func.func @_mlp_kernel(%arg0: i32, %arg1: memref<8x784xbf16, #tpu.memory_space<vmem>>, %arg2: memref<784x512xbf16, #tpu.memory_space<vmem>>, %arg3: memref<1x512xf32, #tpu.memory_space<vmem>>, %arg4: memref<512x256xbf16, #tpu.memory_space<vmem>>, %arg5: memref<1x256xf32, #tpu.memory_space<vmem>>, %arg6: memref<256x128xbf16, #tpu.memory_space<vmem>>, %arg7: memref<1x128xf32, #tpu.memory_space<vmem>>, %arg8: memref<8x128xf32, #tpu.memory_space<vmem>>) attributes {dimension_semantics = [#tpu.dimension_semantics<parallel>], iteration_bounds = array<i64: 1>, scalar_prefetch = 0 : i64, scratch_operands = 0 : i64, tpu.core_type = #tpu.core_type<tc>, window_params = [{transform_indices = @transform_0, window_bounds = array<i64: 8, 784>}, {pipeline_mode = #tpu.pipeline_mode<synchronous>, transform_indices = @transform_1, window_bounds = array<i64: 784, 512>}, {pipeline_mode = #tpu.pipeline_mode<synchronous>, transform_indices = @transform_2, window_bounds = array<i64: 1, 512>}, {pipeline_mode = #tpu.pipeline_mode<synchronous>, transform_indices = @transform_3, window_bounds = array<i64: 512, 256>}, {pipeline_mode = #tpu.pipeline_mode<synchronous>, transform_indices = @transform_4, window_bounds = array<i64: 1, 256>}, {pipeline_mode = #tpu.pipeline_mode<synchronous>, transform_indices = @transform_5, window_bounds = array<i64: 256, 128>}, {pipeline_mode = #tpu.pipeline_mode<synchronous>, transform_indices = @transform_6, window_bounds = array<i64: 1, 128>}, {transform_indices = @transform_7, window_bounds = array<i64: 8, 128>}]} {
    %c0 = arith.constant 0 : index
    %c0_0 = arith.constant 0 : index
    %0 = vector.load %arg1[%c0, %c0_0] : memref<8x784xbf16, #tpu.memory_space<vmem>>, vector<8x784xbf16>
    %c0_1 = arith.constant 0 : index
    %c0_2 = arith.constant 0 : index
    %1 = vector.load %arg2[%c0_1, %c0_2] : memref<784x512xbf16, #tpu.memory_space<vmem>>, vector<784x512xbf16>
    %cst = arith.constant dense<0.000000e+00> : vector<8x512xf32>
    %2 = tpu.matmul %0, %1, %cst {dimension_numbers = #tpu.dot_dimension_numbers<[1], [0], [0], [1], [0, 0, 1, 1], [], []>} : vector<8x784xbf16>, vector<784x512xbf16>, vector<8x512xf32> -> vector<8x512xf32>
    %c0_3 = arith.constant 0 : index
    %c0_4 = arith.constant 0 : index
    %3 = vector.load %arg3[%c0_3, %c0_4] : memref<1x512xf32, #tpu.memory_space<vmem>>, vector<1x512xf32>
    %4 = vector.broadcast %3 : vector<1x512xf32> to vector<8x512xf32>
    %5 = arith.addf %2, %4 : vector<8x512xf32>
    %cst_5 = arith.constant 0.000000e+00 : f32
    %6 = vector.broadcast %cst_5 : f32 to vector<8x512xf32>
    %7 = arith.maximumf %5, %6 : vector<8x512xf32>
    %8 = arith.truncf %7 : vector<8x512xf32> to vector<8x512xbf16>
    %c0_6 = arith.constant 0 : index
    %c0_7 = arith.constant 0 : index
    %9 = vector.load %arg4[%c0_6, %c0_7] : memref<512x256xbf16, #tpu.memory_space<vmem>>, vector<512x256xbf16>
    %cst_8 = arith.constant dense<0.000000e+00> : vector<8x256xf32>
    %10 = tpu.matmul %8, %9, %cst_8 {dimension_numbers = #tpu.dot_dimension_numbers<[1], [0], [0], [1], [0, 0, 1, 1], [], []>} : vector<8x512xbf16>, vector<512x256xbf16>, vector<8x256xf32> -> vector<8x256xf32>
    %c0_9 = arith.constant 0 : index
    %c0_10 = arith.constant 0 : index
    %11 = vector.load %arg5[%c0_9, %c0_10] : memref<1x256xf32, #tpu.memory_space<vmem>>, vector<1x256xf32>
    %12 = vector.broadcast %11 : vector<1x256xf32> to vector<8x256xf32>
    %13 = arith.addf %10, %12 : vector<8x256xf32>
    %cst_11 = arith.constant 0.000000e+00 : f32
    %14 = vector.broadcast %cst_11 : f32 to vector<8x256xf32>
    %15 = arith.maximumf %13, %14 : vector<8x256xf32>
    %16 = arith.truncf %15 : vector<8x256xf32> to vector<8x256xbf16>
    %c0_12 = arith.constant 0 : index
    %c0_13 = arith.constant 0 : index
    %17 = vector.load %arg6[%c0_12, %c0_13] : memref<256x128xbf16, #tpu.memory_space<vmem>>, vector<256x128xbf16>
    %cst_14 = arith.constant dense<0.000000e+00> : vector<8x128xf32>
    %18 = tpu.matmul %16, %17, %cst_14 {dimension_numbers = #tpu.dot_dimension_numbers<[1], [0], [0], [1], [0, 0, 1, 1], [], []>} : vector<8x256xbf16>, vector<256x128xbf16>, vector<8x128xf32> -> vector<8x128xf32>
    %c0_15 = arith.constant 0 : index
    %c0_16 = arith.constant 0 : index
    %19 = vector.load %arg7[%c0_15, %c0_16] : memref<1x128xf32, #tpu.memory_space<vmem>>, vector<1x128xf32>
    %20 = vector.broadcast %19 : vector<1x128xf32> to vector<8x128xf32>
    %21 = arith.addf %18, %20 : vector<8x128xf32>
    %c0_17 = arith.constant 0 : index
    %c0_18 = arith.constant 0 : index
    %22 = vector.load %arg8[%c0_17, %c0_18] : memref<8x128xf32, #tpu.memory_space<vmem>>, vector<8x128xf32>
    tpu.vector_store %arg8[%c0_17, %c0_18], %21 {strides = array<i32>} : memref<8x128xf32, #tpu.memory_space<vmem>>, vector<8x128xf32>,
    return
  }
  func.func @transform_0(%arg0: i32) -> (i32, i32) {
    %c0_i32 = arith.constant 0 : i32
    %c0_i32_0 = arith.constant 0 : i32
    return %arg0, %c0_i32 : i32, i32
  }
  func.func @transform_1(%arg0: i32) -> (i32, i32) {
    %c0_i32 = arith.constant 0 : i32
    %c0_i32_0 = arith.constant 0 : i32
    %c0_i32_1 = arith.constant 0 : i32
    return %c0_i32, %c0_i32_0 : i32, i32
  }
  func.func @transform_2(%arg0: i32) -> (i32, i32) {
    %c0_i32 = arith.constant 0 : i32
    %c0_i32_0 = arith.constant 0 : i32
    %c0_i32_1 = arith.constant 0 : i32
    return %c0_i32, %c0_i32_0 : i32, i32
  }
  func.func @transform_3(%arg0: i32) -> (i32, i32) {
    %c0_i32 = arith.constant 0 : i32
    %c0_i32_0 = arith.constant 0 : i32
    %c0_i32_1 = arith.constant 0 : i32
    return %c0_i32, %c0_i32_0 : i32, i32
  }
  func.func @transform_4(%arg0: i32) -> (i32, i32) {
    %c0_i32 = arith.constant 0 : i32
    %c0_i32_0 = arith.constant 0 : i32
    %c0_i32_1 = arith.constant 0 : i32
    return %c0_i32, %c0_i32_0 : i32, i32
  }
  func.func @transform_5(%arg0: i32) -> (i32, i32) {
    %c0_i32 = arith.constant 0 : i32
    %c0_i32_0 = arith.constant 0 : i32
    %c0_i32_1 = arith.constant 0 : i32
    return %c0_i32, %c0_i32_0 : i32, i32
  }
  func.func @transform_6(%arg0: i32) -> (i32, i32) {
    %c0_i32 = arith.constant 0 : i32
    %c0_i32_0 = arith.constant 0 : i32
    %c0_i32_1 = arith.constant 0 : i32
    return %c0_i32, %c0_i32_0 : i32, i32
  }
  func.func @transform_7(%arg0: i32) -> (i32, i32) {
    %c0_i32 = arith.constant 0 : i32
    %c0_i32_0 = arith.constant 0 : i32
    return %arg0, %c0_i32 : i32, i32
  }
}

</mosaic_0001>

<bundles_post_ra>
// kernel: mlp_forward.1
= control target key start
LH: loop header
LB: loop body
LE: loop exit
PB: predicated region body
PF: predicated region fallthrough
CT: control target
= control target key end

     0   :  { %12 = vsyncpa [#allocation3], 0  ;;  %s3483_s0 = inlined_call_operand.vmem [shape: bf16[8,784], index: 0, kind: input, shape index: {}]   ;;  %s3484_s1 = inlined_call_operand.hbm [shape: bf16[784,512], index: 1, kind: input, shape index: {}]   ;;  %s3485_s2 = inlined_call_operand.hbm [shape: f32[1,512], index: 2, kind: input, shape index: {}]   ;;  %s3486_s3 = inlined_call_operand.vmem [shape: bf16[512,256], index: 3, kind: input, shape index: {}]   ;;  %s3487_s4 = inlined_call_operand.hbm [shape: f32[1,256], index: 4, kind: input, shape index: {}]   ;;  %s3488_s5 = inlined_call_operand.hbm [shape: bf16[256,128], index: 5, kind: input, shape index: {}]   ;;  %s3489_s6 = inlined_call_operand.vmem [shape: f32[1,128], index: 6, kind: input, shape index: {}]   ;;  %s3490_s7 = inlined_call_operand.hbm [shape: f32[8,128], index: 7, kind: output, shape index: {}]  }
   0x1   :  { %13 = vsyncpa [#allocation6], 0 }
   0x2   :  { %14 = vsyncpa [#allocation9], 0 }
   0x3   :  { %15 = vsyncpa [#allocation4], 0  ;;  %s3159_s24 = smov [#allocation5]   ;;  %s3160_s26 = smov [#allocation2]  }
   0x4   :  { %s36_s25 = sshll.u32 %s3159_s24, 4  ;;  %s23_s27 = sshll.u32 %s3160_s26, 4  ;;  %s37_s25 = int_to_ptr.vmem [resolvable:$true] %s36_s25  ;;  %s24_s27 = int_to_ptr.vmem [resolvable:$true] %s23_s27 }
   0x5   :  { %s3059_s28 = scalar_lea.vmem %s37_s25, 64  ;;  %p3064_p1 = scmp.lt.s32.totalorder %s37_s25, %s37_s25 }
   0x6   :  { %p3060_p0 = scmp.ne.s32.totalorder %s37_s25, %s3059_s28  ;;  %p3065_p2 = scmp.lt.s32.totalorder %s3059_s28, %s3059_s28 }
   0x8   :  { %p3066_p3 = por %p3065_p2, %p3064_p1 }
   0xa   :  { %p3067_p4 = pnand %p3066_p3, %p3060_p0 }
   0xc   :  { %3070 = shalt.err (!%p3067_p4)
}
   0xd   :  { %39 = dma.hbm_to_vmem [thread:$0]  %s3485_s2, 64, %s37_s25, [#allocation6]  }
   0xe   :  { %s3079_s8 = scalar_lea.vmem %s24_s27, 25088  ;;  %p3084_p6 = scmp.lt.s32.totalorder %s24_s27, %s24_s27 }
   0xf   :  { %p3080_p5 = scmp.ne.s32.totalorder %s24_s27, %s3079_s8  ;;  %p3085_p7 = scmp.lt.s32.totalorder %s3079_s8, %s3079_s8 }
  0x11   :  { %p3086_p8 = por %p3085_p7, %p3084_p6 }
  0x13   :  { %p3087_p9 = pnand %p3086_p8, %p3080_p5 }
  0x15   :  { %3090 = shalt.err (!%p3087_p9)
}
  0x16   :  { %s3161_s9 = smov 256   ;;  %s3162_s10 = smov 16  }
  0x17   :  { %29 = dma.hbm_to_vmem [thread:$0]  %s3484_s1, 25088, %s24_s27, [#allocation3], %s3161_s9, %s3161_s9, %s3162_s10  }
  0x18   :  { %s3163_s13 = smov [#allocation7]   ;;  %s3164_s15 = smov [#allocation8]  }
  0x19   :  { %s48_s14 = sshll.u32 %s3163_s13, 4  ;;  %s57_s16 = sshll.u32 %s3164_s15, 4  ;;  %s49_s14 = int_to_ptr.vmem [resolvable:$true] %s48_s14  ;;  %s58_s16 = int_to_ptr.vmem [resolvable:$true] %s57_s16 }
  0x1a   :  { %s3099_s2 = scalar_lea.vmem %s49_s14, 32  ;;  %p3104_p11 = scmp.lt.s32.totalorder %s49_s14, %s49_s14 }
  0x1b   :  { %p3100_p10 = scmp.ne.s32.totalorder %s49_s14, %s3099_s2  ;;  %p3105_p12 = scmp.lt.s32.totalorder %s3099_s2, %s3099_s2 }
  0x1d   :  { %p3106_p13 = por %p3105_p12, %p3104_p11 }
  0x1f   :  { %p3107_p0 = pnand %p3106_p13, %p3100_p10 }
  0x21   :  { %3110 = shalt.err (!%p3107_p0)
}
  0x22   :  { %51 = dma.hbm_to_vmem [thread:$0]  %s3487_s4, 32, %s49_s14, [#allocation6]  }
  0x23   :  { %s3119_s19 = scalar_lea.vmem %s58_s16, 2048  ;;  %p3124_p2 = scmp.lt.s32.totalorder %s58_s16, %s58_s16 }
  0x24   :  { %p3120_p1 = scmp.ne.s32.totalorder %s58_s16, %s3119_s19  ;;  %p3125_p3 = scmp.lt.s32.totalorder %s3119_s19, %s3119_s19 }
  0x26   :  { %p3126_p4 = por %p3125_p3, %p3124_p2 }
  0x28   :  { %p3127_p5 = pnand %p3126_p4, %p3120_p1 }
  0x2a   :  { %3130 = shalt.err (!%p3127_p5)
}
  0x2b   :  { %s3165_s1 = smov 64   ;;  %s3166_s20 = smov 4  }
  0x2c   :  { %63 = dma.hbm_to_vmem [thread:$0]  %s3488_s5, 2048, %s58_s16, [#allocation9], %s3165_s1, %s3165_s1, %s3166_s20  }
  0x2d   :  { %3151 = dma.done.wait [#allocation3], 25088  }
  0x2e   :  { %3152 = vsyncadd [#allocation3], 4294942208 }
  0x2f   :  { %3153 = dma.done.wait [#allocation6], 96  }
  0x30   :  { %3154 = vsyncadd [#allocation6], 4294967200 }
  0x31   :  { %3155 = dma.done.wait [#allocation9], 2048  }
  0x32   :  { %3156 = vsyncadd [#allocation9], 4294965248  ;;  %v2638_v0 = vld [vmem:[#allocation2 + $0xe4] ss:$16 sps:$4 sm:$0xff]   ;;  %v2642_v2 = vld [vmem:[#allocation2 + $0xe0] ss:$16 sps:$4 sm:$0xff]  }
  0x33   :  { %v2640_v1 = vld [vmem:[#allocation2 + $0x2e4] ss:$16 sps:$4 sm:$0xff]   ;;  %1309 = vmatprep.subr.bf16.mxu0 %v2638_v0  ;;  %v2643_v3 = vld [vmem:[#allocation2 + $0x2e0] ss:$16 sps:$4 sm:$0xff]   ;;  %v80_v48 = vld [vmem:[%s3483_s0 + $0x8] sm:$0xff]  ;;  %vm1305_vm0 = vcmask 130048  }
  0x34   :  { %1350 = vmatprep.subr.bf16.mxu1 %v2640_v1  ;;  %v2644_v4 = vld [vmem:[#allocation2 + $0xc4] ss:$16 sps:$4 sm:$0xff]   ;;  %1310 = vmatpush1.bf16.msra.mxu0 %v2642_v2  ;;  %v2648_v6 = vld [vmem:[#allocation2 + $0xc0] ss:$16 sps:$4 sm:$0xff]   ;;  %v3229_v51 = vcombine.high %v80_v48, %v80_v48  ;;  %s3168_s20 = smov [#allocation10]  }
  0x35   :  { %1351 = vmatpush1.bf16.msra.mxu1 %v2643_v3  ;;  %v2646_v5 = vld [vmem:[#allocation2 + $0x2c4] ss:$16 sps:$4 sm:$0xff]   ;;  %1311 = vmatprep.subr.bf16.mxu0 %v2644_v4  ;;  %v2649_v7 = vld [vmem:[#allocation2 + $0x2c0] ss:$16 sps:$4 sm:$0xff]   ;;  %s2309_s21 = sshll.u32 %s3168_s20, 4  ;;  %s2310_s21 = int_to_ptr.vmem [resolvable:$true] %s2309_s21 }
  0x36   :  { %1352 = vmatprep.subr.bf16.mxu1 %v2646_v5  ;;  %v2650_v8 = vld [vmem:[#allocation2 + $0xa4] ss:$16 sps:$4 sm:$0xff]   ;;  %v2654_v10 = vld [vmem:[#allocation2 + $0xa0] ss:$16 sps:$4 sm:$0xff]   ;;  %1382 = vmatprep.mubr.bf16.mxu1 %v3229_v51  ;;  %s3131_s22 = scalar_lea.vmem %s2310_s21, 128  ;;  %p3136_p7 = scmp.lt.s32.totalorder %s2310_s21, %s2310_s21 }
  0x37   :  { %v2652_v9 = vld [vmem:[#allocation2 + $0x2a4] ss:$16 sps:$4 sm:$0xff]   ;;  %v2655_v11 = vld [vmem:[#allocation2 + $0x2a0] ss:$16 sps:$4 sm:$0xff]   ;;  %p3132_p6 = scmp.ne.s32.totalorder %s2310_s21, %s3131_s22  ;;  %p3137_p8 = scmp.lt.s32.totalorder %s3131_s22, %s3131_s22 }
  0x38   :  { %1312 = vmatpush1.bf16.msra.mxu0 %v2648_v6  ;;  %v2656_v12 = vld [vmem:[#allocation2 + $0x84] ss:$16 sps:$4 sm:$0xff]   ;;  %v2660_v14 = vld [vmem:[#allocation2 + $0x80] ss:$16 sps:$4 sm:$0xff]  }
  0x39   :  { %1353 = vmatpush1.bf16.msra.mxu1 %v2649_v7  ;;  %1313 = vmatprep.subr.bf16.mxu0 %v2650_v8  ;;  %v2658_v13 = vld [vmem:[#allocation2 + $0x284] ss:$16 sps:$4 sm:$0xff]   ;;  %v2661_v15 = vld [vmem:[#allocation2 + $0x280] ss:$16 sps:$4 sm:$0xff]   ;;  %v3235_v7 = vcombine.low %v80_v48, %v80_v48  ;;  %v2798_v48 = vld [vmem:[#allocation2 + $0x1ec] ss:$16 sps:$4 sm:$0xff]   ;;  %p3138_p9 = por %p3137_p8, %p3136_p7 }
  0x3a   :  { %1354 = vmatprep.subr.bf16.mxu1 %v2652_v9  ;;  %v2662_v16 = vld [vmem:[#allocation2 + $0x64] ss:$16 sps:$4 sm:$0xff]   ;;  %v2666_v18 = vld [vmem:[#allocation2 + $0x60] ss:$16 sps:$4 sm:$0xff]  }
  0x3b   :  { %v2664_v17 = vld [vmem:[#allocation2 + $0x264] ss:$16 sps:$4 sm:$0xff]   ;;  %v2667_v19 = vld [vmem:[#allocation2 + $0x260] ss:$16 sps:$4 sm:$0xff]   ;;  %p3139_p10 = pnand %p3138_p9, %p3132_p6 }
  0x3c   :  { %1314 = vmatpush1.bf16.msra.mxu0 %v2654_v10  ;;  %v2668_v20 = vld [vmem:[#allocation2 + $0x44] ss:$16 sps:$4 sm:$0xff]   ;;  %v2672_v22 = vld [vmem:[#allocation2 + $0x40] ss:$16 sps:$4 sm:$0xff]  }
  0x3d   :  { %1355 = vmatpush1.bf16.msra.mxu1 %v2655_v11  ;;  %1315 = vmatprep.subr.bf16.mxu0 %v2656_v12  ;;  %v2670_v21 = vld [vmem:[#allocation2 + $0x244] ss:$16 sps:$4 sm:$0xff]   ;;  %v2673_v23 = vld [vmem:[#allocation2 + $0x240] ss:$16 sps:$4 sm:$0xff]   ;;  %v2749_v11 = vld [vmem:[#allocation2 + $0xec] ss:$16 sps:$4 sm:$0xff]  }
  0x3e   :  { %1356 = vmatprep.subr.bf16.mxu1 %v2658_v13  ;;  %v2674_v24 = vld [vmem:[#allocation2 + $0x24] ss:$16 sps:$4 sm:$0xff]   ;;  %v2678_v26 = vld [vmem:[#allocation2 + $0x20] ss:$16 sps:$4 sm:$0xff]   ;;  %v3167_v13 = vmov 0  }
  0x3f   :  { %v2676_v25 = vld [vmem:[#allocation2 + $0x224] ss:$16 sps:$4 sm:$0xff]   ;;  %v2679_v27 = vld [vmem:[#allocation2 + $0x220] ss:$16 sps:$4 sm:$0xff]  }
  0x40   :  { %1316 = vmatpush1.bf16.msra.mxu0 %v2660_v14  ;;  %v2680_v28 = vld [vmem:[#allocation2 + $0x4] ss:$16 sps:$4 sm:$0xff]   ;;  %v2684_v30 = vld [vmem:[#allocation2] ss:$16 sps:$4 sm:$0xff]  }
  0x41   :  { %1357 = vmatpush1.bf16.msra.mxu1 %v2661_v15  ;;  %1317 = vmatprep.subr.bf16.mxu0 %v2662_v16  ;;  %v2682_v29 = vld [vmem:[#allocation2 + $0x204] ss:$16 sps:$4 sm:$0xff]   ;;  %v2685_v31 = vld [vmem:[#allocation2 + $0x200] ss:$16 sps:$4 sm:$0xff]   ;;  %v2747_v15 = vld [vmem:[#allocation2 + $0xe8] ss:$16 sps:$4 sm:$0xff]  }
  0x42   :  { %1358 = vmatprep.subr.bf16.mxu1 %v2664_v17  ;;  %v2686_v32 = vld [vmem:[#allocation2 + $0x1e4] ss:$16 sps:$4 sm:$0xff]   ;;  %v2690_v34 = vld [vmem:[#allocation2 + $0x1e0] ss:$16 sps:$4 sm:$0xff]   ;;  %v3243_v17 = vld [vmem:[%s3483_s0 + $0x18] ss:$0 sps:$4 sm:$0xff]  }
  0x43   :  { %v2688_v33 = vld [vmem:[#allocation2 + $0x3e4] ss:$16 sps:$4 sm:$0xff]   ;;  %v2691_v35 = vld [vmem:[#allocation2 + $0x3e0] ss:$16 sps:$4 sm:$0xff]  }
  0x44   :  { %1318 = vmatpush1.bf16.msra.mxu0 %v2666_v18  ;;  %v2692_v36 = vld [vmem:[#allocation2 + $0x1c4] ss:$16 sps:$4 sm:$0xff]   ;;  %v2696_v38 = vld [vmem:[#allocation2 + $0x1c0] ss:$16 sps:$4 sm:$0xff]   ;;  %v2756_v18 = vld [vmem:[#allocation2 + $0xcc] ss:$16 sps:$4 sm:$0xff]  }
  0x45   :  { %1359 = vmatpush1.bf16.msra.mxu1 %v2667_v19  ;;  %1319 = vmatprep.subr.bf16.mxu0 %v2668_v20  ;;  %v2694_v37 = vld [vmem:[#allocation2 + $0x3c4] ss:$16 sps:$4 sm:$0xff]   ;;  %v2697_v39 = vld [vmem:[#allocation2 + $0x3c0] ss:$16 sps:$4 sm:$0xff]   ;;  %v2754_v20 = vld [vmem:[#allocation2 + $0xc8] ss:$16 sps:$4 sm:$0xff]  }
  0x46   :  { %1360 = vmatprep.subr.bf16.mxu1 %v2670_v21  ;;  %v2698_v40 = vld [vmem:[#allocation2 + $0x1a4] ss:$16 sps:$4 sm:$0xff]   ;;  %v2702_v42 = vld [vmem:[#allocation2 + $0x1a0] ss:$16 sps:$4 sm:$0xff]  }
  0x47   :  { %v2700_v41 = vld [vmem:[#allocation2 + $0x3a4] ss:$16 sps:$4 sm:$0xff]   ;;  %v2703_v43 = vld [vmem:[#allocation2 + $0x3a0] ss:$16 sps:$4 sm:$0xff]  }
  0x48   :  { %1320 = vmatpush1.bf16.msra.mxu0 %v2672_v22  ;;  %v2704_v44 = vld [vmem:[#allocation2 + $0x184] ss:$16 sps:$4 sm:$0xff]   ;;  %v2708_v49 = vld [vmem:[#allocation2 + $0x180] ss:$16 sps:$4 sm:$0xff]   ;;  %v2762_v22 = vld [vmem:[#allocation2 + $0xac] ss:$16 sps:$4 sm:$0xff]  }
  0x49   :  { %1361 = vmatpush1.bf16.msra.mxu1 %v2673_v23  ;;  %1321 = vmatprep.subr.bf16.mxu0 %v2674_v24  ;;  %v2706_v45 = vld [vmem:[#allocation2 + $0x384] ss:$16 sps:$4 sm:$0xff]   ;;  %v2709_v50 = vld [vmem:[#allocation2 + $0x380] ss:$16 sps:$4 sm:$0xff]   ;;  %v2760_v24 = vld [vmem:[#allocation2 + $0xa8] ss:$16 sps:$4 sm:$0xff]  }
  0x4a   :  { %1362 = vmatprep.subr.bf16.mxu1 %v2676_v25  ;;  %v79_v46 = vld [vmem:[%s3483_s0] sm:$0xff] }
  0x4b   :  { %v3224_v47 = vcombine.high %v79_v46, %v79_v46  ;;  %v2710_v52 = vld [vmem:[#allocation2 + $0x164] ss:$16 sps:$4 sm:$0xff]   ;;  %v2714_v54 = vld [vmem:[#allocation2 + $0x160] ss:$16 sps:$4 sm:$0xff]   ;;  %v3233_v6 = vcombine.low %v79_v46, %v79_v46  ;;  %v2790_v46 = vld [vmem:[#allocation2 + $0x8] ss:$16 sps:$4 sm:$0xff]  }
  0x4c   :  { %1322 = vmatpush1.bf16.msra.mxu0 %v2678_v26  ;;  %v2712_v53 = vld [vmem:[#allocation2 + $0x364] ss:$16 sps:$4 sm:$0xff]   ;;  %v2715_v55 = vld [vmem:[#allocation2 + $0x360] ss:$16 sps:$4 sm:$0xff]   ;;  %v2768_v26 = vld [vmem:[#allocation2 + $0x8c] ss:$16 sps:$4 sm:$0xff]  }
  0x4d   :  { %1363 = vmatpush1.bf16.msra.mxu1 %v2679_v27  ;;  %1323 = vmatprep.subr.bf16.mxu0 %v2680_v28  ;;  %v2716_v56 = vld [vmem:[#allocation2 + $0x144] ss:$16 sps:$4 sm:$0xff]   ;;  %v2720_v58 = vld [vmem:[#allocation2 + $0x140] ss:$16 sps:$4 sm:$0xff]   ;;  %v2766_v28 = vld [vmem:[#allocation2 + $0x88] ss:$16 sps:$4 sm:$0xff]  }
  0x4e   :  { %1364 = vmatprep.subr.bf16.mxu1 %v2682_v29  ;;  %1341 = vmatprep.mubr.bf16.mxu0 %v3224_v47  ;;  %v2718_v57 = vld [vmem:[#allocation2 + $0x344] ss:$16 sps:$4 sm:$0xff]   ;;  %v2721_v59 = vld [vmem:[#allocation2 + $0x340] ss:$16 sps:$4 sm:$0xff]  }
  0x4f   :  { %v2722_v60 = vld [vmem:[#allocation2 + $0x124] ss:$16 sps:$4 sm:$0xff]   ;;  %v2726_v62 = vld [vmem:[#allocation2 + $0x120] ss:$16 sps:$4 sm:$0xff]  }
  0x50   :  { %1324 = vmatpush1.bf16.msra.mxu0 %v2684_v30  ;;  %v2724_v61 = vld [vmem:[#allocation2 + $0x324] ss:$16 sps:$4 sm:$0xff]   ;;  %v2727_v63 = vld [vmem:[#allocation2 + $0x320] ss:$16 sps:$4 sm:$0xff]   ;;  %v2774_v30 = vld [vmem:[#allocation2 + $0x6c] ss:$16 sps:$4 sm:$0xff]  }
  0x51   :  { %1365 = vmatpush1.bf16.msra.mxu1 %v2685_v31  ;;  %1325 = vmatprep.subr.bf16.mxu0 %v2686_v32  ;;  %v2728_v0 = vld [vmem:[#allocation2 + $0x104] ss:$16 sps:$4 sm:$0xff]   ;;  %v2732_v2 = vld [vmem:[#allocation2 + $0x100] ss:$16 sps:$4 sm:$0xff]  }
  0x52   :  { %1366 = vmatprep.subr.bf16.mxu1 %v2688_v33  ;;  %v2730_v1 = vld [vmem:[#allocation2 + $0x304] ss:$16 sps:$4 sm:$0xff]   ;;  %v2733_v3 = vld [vmem:[#allocation2 + $0x300] ss:$16 sps:$4 sm:$0xff]  }
  0x53   :  { %v2740_v4 = vld [vmem:[#allocation2 + $0x4e4] ss:$16 sps:$4 sm:$0xff]   ;;  %v2738_v8 = vld [vmem:[#allocation2 + $0x4e0] ss:$16 sps:$4 sm:$0xff]  }
  0x54   :  { %1326 = vmatpush2.bf16.msra.mxu0 %v2690_v34  ;;  %v2743_v5 = vld [vmem:[#allocation2 + $0x604] ss:$16 sps:$4 sm:$0xff]   ;;  %v2741_v9 = vld [vmem:[#allocation2 + $0x600] ss:$16 sps:$4 sm:$0xff]   ;;  %v2772_v34 = vld [vmem:[#allocation2 + $0x68] ss:$16 sps:$4 sm:$0xff]  }
  0x55   :  { %1367 = vmatpush2.bf16.msra.mxu1 %v2691_v35  ;;  %1327 = vmatprep.subr.bf16.mxu0 %v2692_v36  ;;  %v2746_v10 = vld [vmem:[#allocation2 + $0x4c4] ss:$16 sps:$4 sm:$0xff]   ;;  %v2744_v12 = vld [vmem:[#allocation2 + $0x4c0] ss:$16 sps:$4 sm:$0xff]   ;;  %v2780_v36 = vld [vmem:[#allocation2 + $0x4c] ss:$16 sps:$4 sm:$0xff]  }
  0x56   :  { %1368 = vmatprep.subr.bf16.mxu1 %v2694_v37  ;;  %v2752_v14 = vld [vmem:[#allocation2 + $0x4a4] ss:$16 sps:$4 sm:$0xff]   ;;  %v2750_v16 = vld [vmem:[#allocation2 + $0x4a0] ss:$16 sps:$4 sm:$0xff]  }
  0x57   :  { %v2759_v19 = vld [vmem:[#allocation2 + $0x484] ss:$16 sps:$4 sm:$0xff]   ;;  %v2757_v21 = vld [vmem:[#allocation2 + $0x480] ss:$16 sps:$4 sm:$0xff]  }
  0x58   :  { %1328 = vmatpush2.bf16.msra.mxu0 %v2696_v38  ;;  %v2765_v23 = vld [vmem:[#allocation2 + $0x464] ss:$16 sps:$4 sm:$0xff]   ;;  %v2763_v25 = vld [vmem:[#allocation2 + $0x460] ss:$16 sps:$4 sm:$0xff]   ;;  %v2778_v38 = vld [vmem:[#allocation2 + $0x48] ss:$16 sps:$4 sm:$0xff]  }
  0x59   :  { %1369 = vmatpush2.bf16.msra.mxu1 %v2697_v39  ;;  %1329 = vmatprep.subr.bf16.mxu0 %v2698_v40  ;;  %v2771_v27 = vld [vmem:[#allocation2 + $0x444] ss:$16 sps:$4 sm:$0xff]   ;;  %v2769_v29 = vld [vmem:[#allocation2 + $0x440] ss:$16 sps:$4 sm:$0xff]   ;;  %v2786_v40 = vld [vmem:[#allocation2 + $0x2c] ss:$16 sps:$4 sm:$0xff]  }
  0x5a   :  { %1370 = vmatprep.subr.bf16.mxu1 %v2700_v41  ;;  %v2777_v31 = vld [vmem:[#allocation2 + $0x424] ss:$16 sps:$4 sm:$0xff]   ;;  %v2775_v35 = vld [vmem:[#allocation2 + $0x420] ss:$16 sps:$4 sm:$0xff]  }
  0x5b   :  { %v3251_v32 = vld [vmem:[%s3483_s0 + $0x10] sm:$0xff] }
  0x5c   :  { %1330 = vmatpush2.bf16.msra.mxu0 %v2702_v42  ;;  %v3255_v33 = vcombine.high %v3251_v32, %v3251_v32  ;;  %v2783_v37 = vld [vmem:[#allocation2 + $0x404] ss:$16 sps:$4 sm:$0xff]   ;;  %v2781_v39 = vld [vmem:[#allocation2 + $0x400] ss:$16 sps:$4 sm:$0xff]   ;;  %v2784_v42 = vld [vmem:[#allocation2 + $0x28] ss:$16 sps:$4 sm:$0xff]  }
  0x5d   :  { %1371 = vmatpush2.bf16.msra.mxu1 %v2703_v43  ;;  %1331 = vmatprep.subr.bf16.mxu0 %v2704_v44  ;;  %v2789_v41 = vld [vmem:[#allocation2 + $0x5e4] ss:$16 sps:$4 sm:$0xff]   ;;  %v2787_v43 = vld [vmem:[#allocation2 + $0x5e0] ss:$16 sps:$4 sm:$0xff]   ;;  %v2792_v44 = vld [vmem:[#allocation2 + $0xc] ss:$16 sps:$4 sm:$0xff]  }
  0x5e   :  { %1372 = vmatprep.subr.bf16.mxu1 %v2706_v45  ;;  %v2795_v45 = vld [vmem:[#allocation2 + $0x5c4] ss:$16 sps:$4 sm:$0xff]  }
  0x60   :  { %1332 = vmatpush2.bf16.msra.mxu0 %v2708_v49  ;;  %v2801_v49 = vld [vmem:[#allocation2 + $0x5a4] ss:$16 sps:$4 sm:$0xff]  }
  0x61   :  { %1373 = vmatpush2.bf16.msra.mxu1 %v2709_v50  ;;  %1333 = vmatprep.subr.bf16.mxu0 %v2710_v52  ;;  %v2796_v50 = vld [vmem:[#allocation2 + $0x1e8] ss:$16 sps:$4 sm:$0xff]   ;;  %v2799_v52 = vld [vmem:[#allocation2 + $0x5a0] ss:$16 sps:$4 sm:$0xff]  }
  0x62   :  { %1374 = vmatprep.subr.bf16.mxu1 %v2712_v53  ;;  %v2804_v53 = vld [vmem:[#allocation2 + $0x1cc] ss:$16 sps:$4 sm:$0xff]  }
  0x64   :  { %1334 = vmatpush2.bf16.msra.mxu0 %v2714_v54  ;;  %v2807_v54 = vld [vmem:[#allocation2 + $0x584] ss:$16 sps:$4 sm:$0xff]  }
  0x65   :  { %1375 = vmatpush2.bf16.msra.mxu1 %v2715_v55  ;;  %1335 = vmatprep.subr.bf16.mxu0 %v2716_v56  ;;  %v2802_v55 = vld [vmem:[#allocation2 + $0x1c8] ss:$16 sps:$4 sm:$0xff]   ;;  %v2805_v56 = vld [vmem:[#allocation2 + $0x580] ss:$16 sps:$4 sm:$0xff]  }
  0x66   :  { %1376 = vmatprep.subr.bf16.mxu1 %v2718_v57  ;;  %v2810_v57 = vld [vmem:[#allocation2 + $0x1ac] ss:$16 sps:$4 sm:$0xff]  }
  0x68   :  { %1336 = vmatpush2.bf16.msra.mxu0 %v2720_v58  ;;  %v2813_v58 = vld [vmem:[#allocation2 + $0x564] ss:$16 sps:$4 sm:$0xff]  }
  0x69   :  { %1377 = vmatpush2.bf16.msra.mxu1 %v2721_v59  ;;  %1337 = vmatprep.subr.bf16.mxu0 %v2722_v60  ;;  %v2808_v59 = vld [vmem:[#allocation2 + $0x1a8] ss:$16 sps:$4 sm:$0xff]   ;;  %v2811_v60 = vld [vmem:[#allocation2 + $0x560] ss:$16 sps:$4 sm:$0xff]  }
  0x6a   :  { %1378 = vmatprep.subr.bf16.mxu1 %v2724_v61  ;;  %v2816_v61 = vld [vmem:[#allocation2 + $0x18c] ss:$16 sps:$4 sm:$0xff]  }
  0x6c   :  { %1338 = vmatpush2.bf16.msra.mxu0 %v2726_v62  ;;  %v2819_v62 = vld [vmem:[#allocation2 + $0x544] ss:$16 sps:$4 sm:$0xff]  }
  0x6d   :  { %1379 = vmatpush2.bf16.msra.mxu1 %v2727_v63  ;;  %1339 = vmatprep.subr.bf16.mxu0 %v2728_v0  ;;  %v2814_v63 = vld [vmem:[#allocation2 + $0x188] ss:$16 sps:$4 sm:$0xff]   ;;  %v2817_v0 = vld [vmem:[#allocation2 + $0x540] ss:$16 sps:$4 sm:$0xff]  }
  0x6e   :  { %1380 = vmatprep.subr.bf16.mxu1 %v2730_v1  ;;  %v2822_v1 = vld [vmem:[#allocation2 + $0x16c] ss:$16 sps:$4 sm:$0xff]  }
  0x70   :  { %1340 = vmatpush2.bf16.msra.mxu0 %v2732_v2  ;;  %v2825_v2 = vld [vmem:[#allocation2 + $0x524] ss:$16 sps:$4 sm:$0xff]  }
  0x71   :  { %1381 = vmatpush2.bf16.msra.mxu1 %v2733_v3  ;;  %1391 = vmatprep.subr.bf16.mxu0 %v2740_v4  ;;  %v2820_v3 = vld [vmem:[#allocation2 + $0x168] ss:$16 sps:$4 sm:$0xff]   ;;  %v2823_v4 = vld [vmem:[#allocation2 + $0x520] ss:$16 sps:$4 sm:$0xff]  }
  0x72   :  { %1446 = vmatprep.subr.bf16.mxu1 %v2743_v5  ;;  %v2828_v5 = vld [vmem:[#allocation2 + $0x14c] ss:$16 sps:$4 sm:$0xff]  }
  0x73   :  { %1342 = vmatmul.mubr.bf16.vlgmr.msra.gmra.mxu0 %v3233_v6 }
  0x74   :  { %1383 = vmatmul.mubr.bf16.vlgmr.msra.gmra.mxu1 %v3235_v7  ;;  %1392 = vmatpush1.bf16.msra.mxu0 %v2738_v8  ;;  %v2831_v8 = vld [vmem:[#allocation2 + $0x504] ss:$16 sps:$4 sm:$0xff]  }
  0x75   :  { %1447 = vmatpush1.bf16.msra.mxu1 %v2741_v9  ;;  %1393 = vmatprep.subr.bf16.mxu0 %v2746_v10  ;;  %v2826_v9 = vld [vmem:[#allocation2 + $0x148] ss:$16 sps:$4 sm:$0xff]   ;;  %v2829_v10 = vld [vmem:[#allocation2 + $0x500] ss:$16 sps:$4 sm:$0xff]  }
  0x76   :  { %1464 = vmatprep.mubr.bf16.mxu1 %v3167_v13  ;;  %1473 = vmatprep.subr.bf16.mxu1 %v2749_v11  ;;  %v2836_v11 = vld [vmem:[#allocation2 + $0x12c] ss:$16 sps:$4 sm:$0xff]  }
  0x77   :  { %1423 = vmatprep.mubr.bf16.mxu0 %v3255_v33 }
  0x78   :  { %1394 = vmatpush1.bf16.msra.mxu0 %v2744_v12  ;;  %v2839_v12 = vld [vmem:[#allocation2 + $0x2ec] ss:$16 sps:$4 sm:$0xff]  }
  0x79   :  { %1395 = vmatprep.subr.bf16.mxu0 %v2752_v14  ;;  %v3260_v14 = vcombine.low %v3251_v32, %v3251_v32  ;;  %v2858_v32 = vld [vmem:[#allocation2 + $0x4a8] ss:$16 sps:$4 sm:$0xff]  }
  0x7c   :  { %2523 = vmatmul.mubr.msk.bf16.vlgmr.msra.gmra.mxu1 %vm1305_vm0, %v3243_v17  ;;  %1396 = vmatpush1.bf16.msra.mxu0 %v2750_v16  ;;  %v2837_v16 = vld [vmem:[#allocation2 + $0x2e8] ss:$16 sps:$4 sm:$0xff]  }
  0x7d   :  { %1474 = vmatpush1.bf16.msra.mxu1 %v2747_v15  ;;  %1397 = vmatprep.subr.bf16.mxu0 %v2759_v19  ;;  %v2834_v15 = vld [vmem:[#allocation2 + $0x128] ss:$16 sps:$4 sm:$0xff]   ;;  %v2845_v19 = vld [vmem:[#allocation2 + $0x2cc] ss:$16 sps:$4 sm:$0xff]  }
  0x7e   :  { %1475 = vmatprep.subr.bf16.mxu1 %v2756_v18  ;;  %1505 = vmatprep.mubr.bf16.mxu1 %v3224_v47  ;;  %v2793_v47 = vld [vmem:[#allocation2 + $0x5c0] ss:$16 sps:$4 sm:$0xff]   ;;  %v2842_v18 = vld [vmem:[#allocation2 + $0x10c] ss:$16 sps:$4 sm:$0xff]  }
  0x80   :  { %1398 = vmatpush1.bf16.msra.mxu0 %v2757_v21  ;;  %v2843_v21 = vld [vmem:[#allocation2 + $0x2c8] ss:$16 sps:$4 sm:$0xff]  }
  0x81   :  { %1476 = vmatpush1.bf16.msra.mxu1 %v2754_v20  ;;  %1399 = vmatprep.subr.bf16.mxu0 %v2765_v23  ;;  %v2840_v20 = vld [vmem:[#allocation2 + $0x108] ss:$16 sps:$4 sm:$0xff]   ;;  %v2851_v23 = vld [vmem:[#allocation2 + $0x2ac] ss:$16 sps:$4 sm:$0xff]  }
  0x82   :  { %1477 = vmatprep.subr.bf16.mxu1 %v2762_v22  ;;  %v2848_v22 = vld [vmem:[#allocation2 + $0x4ec] ss:$16 sps:$4 sm:$0xff]  }
  0x84   :  { %1400 = vmatpush1.bf16.msra.mxu0 %v2763_v25  ;;  %v2849_v25 = vld [vmem:[#allocation2 + $0x2a8] ss:$16 sps:$4 sm:$0xff]  }
  0x85   :  { %1478 = vmatpush1.bf16.msra.mxu1 %v2760_v24  ;;  %1401 = vmatprep.subr.bf16.mxu0 %v2771_v27  ;;  %v2846_v24 = vld [vmem:[#allocation2 + $0x4e8] ss:$16 sps:$4 sm:$0xff]   ;;  %v2857_v27 = vld [vmem:[#allocation2 + $0x28c] ss:$16 sps:$4 sm:$0xff]  }
  0x86   :  { %1479 = vmatprep.subr.bf16.mxu1 %v2768_v26  ;;  %v2854_v26 = vld [vmem:[#allocation2 + $0x4cc] ss:$16 sps:$4 sm:$0xff]  }
  0x88   :  { %1402 = vmatpush1.bf16.msra.mxu0 %v2769_v29  ;;  %v2855_v29 = vld [vmem:[#allocation2 + $0x288] ss:$16 sps:$4 sm:$0xff]  }
  0x89   :  { %1480 = vmatpush1.bf16.msra.mxu1 %v2766_v28  ;;  %1403 = vmatprep.subr.bf16.mxu0 %v2777_v31  ;;  %v2852_v28 = vld [vmem:[#allocation2 + $0x4c8] ss:$16 sps:$4 sm:$0xff]   ;;  %v2863_v31 = vld [vmem:[#allocation2 + $0x26c] ss:$16 sps:$4 sm:$0xff]  }
  0x8a   :  { %1481 = vmatprep.subr.bf16.mxu1 %v2774_v30  ;;  %v2860_v30 = vld [vmem:[#allocation2 + $0x4ac] ss:$16 sps:$4 sm:$0xff]  }
  0x8c   :  { %1404 = vmatpush1.bf16.msra.mxu0 %v2775_v35  ;;  %v2869_v35 = vld [vmem:[#allocation2 + $0x24c] ss:$16 sps:$4 sm:$0xff]  }
  0x8d   :  { %1482 = vmatpush1.bf16.msra.mxu1 %v2772_v34  ;;  %1405 = vmatprep.subr.bf16.mxu0 %v2783_v37  ;;  %v2866_v34 = vld [vmem:[#allocation2 + $0x48c] ss:$16 sps:$4 sm:$0xff]  }
  0x8e   :  { %1483 = vmatprep.subr.bf16.mxu1 %v2780_v36  ;;  %v2864_v36 = vld [vmem:[#allocation2 + $0x488] ss:$16 sps:$4 sm:$0xff]   ;;  %v2872_v37 = vld [vmem:[#allocation2 + $0x46c] ss:$16 sps:$4 sm:$0xff]  }
  0x90   :  { %1406 = vmatpush1.bf16.msra.mxu0 %v2781_v39  ;;  %v2870_v39 = vld [vmem:[#allocation2 + $0x468] ss:$16 sps:$4 sm:$0xff]  }
  0x91   :  { %1484 = vmatpush1.bf16.msra.mxu1 %v2778_v38  ;;  %1407 = vmatprep.subr.bf16.mxu0 %v2789_v41  ;;  %v2875_v38 = vld [vmem:[#allocation2 + $0x22c] ss:$16 sps:$4 sm:$0xff]  }
  0x92   :  { %1485 = vmatprep.subr.bf16.mxu1 %v2786_v40  ;;  %v2873_v40 = vld [vmem:[#allocation2 + $0x228] ss:$16 sps:$4 sm:$0xff]   ;;  %v2881_v41 = vld [vmem:[#allocation2 + $0x20c] ss:$16 sps:$4 sm:$0xff]  }
  0x94   :  { %1408 = vmatpush2.bf16.msra.mxu0 %v2787_v43  ;;  %v2879_v43 = vld [vmem:[#allocation2 + $0x208] ss:$16 sps:$4 sm:$0xff]  }
  0x95   :  { %1486 = vmatpush1.bf16.msra.mxu1 %v2784_v42  ;;  %1409 = vmatprep.subr.bf16.mxu0 %v2795_v45  ;;  %v2876_v42 = vld [vmem:[#allocation2 + $0x448] ss:$16 sps:$4 sm:$0xff]   ;;  %v2887_v45 = vld [vmem:[#allocation2 + $0x3ec] ss:$16 sps:$4 sm:$0xff]  }
  0x96   :  { %1487 = vmatprep.subr.bf16.mxu1 %v2792_v44  ;;  %v2884_v44 = vld [vmem:[#allocation2 + $0x42c] ss:$16 sps:$4 sm:$0xff]  }
  0x98   :  { %1410 = vmatpush2.bf16.msra.mxu0 %v2793_v47  ;;  %v2885_v47 = vld [vmem:[#allocation2 + $0x3e8] ss:$16 sps:$4 sm:$0xff]  }
  0x99   :  { %1488 = vmatpush1.bf16.msra.mxu1 %v2790_v46  ;;  %1411 = vmatprep.subr.bf16.mxu0 %v2801_v49  ;;  %v2882_v46 = vld [vmem:[#allocation2 + $0x428] ss:$16 sps:$4 sm:$0xff]   ;;  %v2893_v49 = vld [vmem:[#allocation2 + $0x3cc] ss:$16 sps:$4 sm:$0xff]  }
  0x9a   :  { %1489 = vmatprep.subr.bf16.mxu1 %v2798_v48  ;;  %v2890_v48 = vld [vmem:[#allocation2 + $0x40c] ss:$16 sps:$4 sm:$0xff]  }
  0x9c   :  { %1412 = vmatpush2.bf16.msra.mxu0 %v2799_v52  ;;  %v2891_v52 = vld [vmem:[#allocation2 + $0x3c8] ss:$16 sps:$4 sm:$0xff]  }
  0x9d   :  { %1490 = vmatpush2.bf16.msra.mxu1 %v2796_v50  ;;  %1413 = vmatprep.subr.bf16.mxu0 %v2807_v54  ;;  %v2888_v50 = vld [vmem:[#allocation2 + $0x408] ss:$16 sps:$4 sm:$0xff]   ;;  %v2899_v54 = vld [vmem:[#allocation2 + $0x3ac] ss:$16 sps:$4 sm:$0xff]  }
  0x9e   :  { %1491 = vmatprep.subr.bf16.mxu1 %v2804_v53  ;;  %v2896_v53 = vld [vmem:[#allocation2 + $0x5ec] ss:$16 sps:$4 sm:$0xff]  }
  0xa0   :  { %1414 = vmatpush2.bf16.msra.mxu0 %v2805_v56  ;;  %v2897_v56 = vld [vmem:[#allocation2 + $0x3a8] ss:$16 sps:$4 sm:$0xff]  }
  0xa1   :  { %1492 = vmatpush2.bf16.msra.mxu1 %v2802_v55  ;;  %1415 = vmatprep.subr.bf16.mxu0 %v2813_v58  ;;  %v2894_v55 = vld [vmem:[#allocation2 + $0x5e8] ss:$16 sps:$4 sm:$0xff]   ;;  %v2905_v58 = vld [vmem:[#allocation2 + $0x38c] ss:$16 sps:$4 sm:$0xff]  }
  0xa2   :  { %1493 = vmatprep.subr.bf16.mxu1 %v2810_v57  ;;  %v2902_v57 = vld [vmem:[#allocation2 + $0x5cc] ss:$16 sps:$4 sm:$0xff]  }
  0xa4   :  { %1416 = vmatpush2.bf16.msra.mxu0 %v2811_v60  ;;  %v2903_v60 = vld [vmem:[#allocation2 + $0x388] ss:$16 sps:$4 sm:$0xff]  }
  0xa5   :  { %1494 = vmatpush2.bf16.msra.mxu1 %v2808_v59  ;;  %1417 = vmatprep.subr.bf16.mxu0 %v2819_v62  ;;  %v2900_v59 = vld [vmem:[#allocation2 + $0x5c8] ss:$16 sps:$4 sm:$0xff]   ;;  %v2911_v62 = vld [vmem:[#allocation2 + $0x36c] ss:$16 sps:$4 sm:$0xff]  }
  0xa6   :  { %1495 = vmatprep.subr.bf16.mxu1 %v2816_v61  ;;  %v2908_v61 = vld [vmem:[#allocation2 + $0x5ac] ss:$16 sps:$4 sm:$0xff]  }
  0xa8   :  { %1418 = vmatpush2.bf16.msra.mxu0 %v2817_v0  ;;  %v2909_v0 = vld [vmem:[#allocation2 + $0x368] ss:$16 sps:$4 sm:$0xff]  }
  0xa9   :  { %1496 = vmatpush2.bf16.msra.mxu1 %v2814_v63  ;;  %1419 = vmatprep.subr.bf16.mxu0 %v2825_v2  ;;  %v2906_v63 = vld [vmem:[#allocation2 + $0x5a8] ss:$16 sps:$4 sm:$0xff]   ;;  %v2917_v2 = vld [vmem:[#allocation2 + $0x34c] ss:$16 sps:$4 sm:$0xff]  }
  0xaa   :  { %1497 = vmatprep.subr.bf16.mxu1 %v2822_v1  ;;  %v2914_v1 = vld [vmem:[#allocation2 + $0x58c] ss:$16 sps:$4 sm:$0xff]  }
  0xac   :  { %1420 = vmatpush2.bf16.msra.mxu0 %v2823_v4  ;;  %v2915_v4 = vld [vmem:[#allocation2 + $0x348] ss:$16 sps:$4 sm:$0xff]  }
  0xad   :  { %1498 = vmatpush2.bf16.msra.mxu1 %v2820_v3  ;;  %1421 = vmatprep.subr.bf16.mxu0 %v2831_v8  ;;  %v2912_v3 = vld [vmem:[#allocation2 + $0x588] ss:$16 sps:$4 sm:$0xff]   ;;  %v2923_v8 = vld [vmem:[#allocation2 + $0x32c] ss:$16 sps:$4 sm:$0xff]  }
  0xae   :  { %1499 = vmatprep.subr.bf16.mxu1 %v2828_v5  ;;  %v2920_v5 = vld [vmem:[#allocation2 + $0x56c] ss:$16 sps:$4 sm:$0xff]  }
  0xb0   :  { %1422 = vmatpush2.bf16.msra.mxu0 %v2829_v10  ;;  %v2921_v10 = vld [vmem:[#allocation2 + $0x328] ss:$16 sps:$4 sm:$0xff]  }
  0xb1   :  { %1500 = vmatpush2.bf16.msra.mxu1 %v2826_v9  ;;  %1514 = vmatprep.subr.bf16.mxu0 %v2839_v12  ;;  %v2918_v9 = vld [vmem:[#allocation2 + $0x568] ss:$16 sps:$4 sm:$0xff]   ;;  %v2929_v12 = vld [vmem:[#allocation2 + $0x30c] ss:$16 sps:$4 sm:$0xff]  }
  0xb2   :  { %1501 = vmatprep.subr.bf16.mxu1 %v2836_v11  ;;  %v2926_v11 = vld [vmem:[#allocation2 + $0x54c] ss:$16 sps:$4 sm:$0xff]  }
  0xb3   :  { %1424 = vmatmul.mubr.bf16.vlgmr.msra.gmra.mxu0 %v3260_v14 }
  0xb4   :  { %1515 = vmatpush1.bf16.msra.mxu0 %v2837_v16  ;;  %1546 = vmatprep.mubr.bf16.mxu0 %v3229_v51  ;;  %v2861_v51 = vld [vmem:[#allocation2 + $0x268] ss:$16 sps:$4 sm:$0xff]  }
  0xb5   :  { %1502 = vmatpush2.bf16.msra.mxu1 %v2834_v15  ;;  %1516 = vmatprep.subr.bf16.mxu0 %v2845_v19  ;;  %v2924_v15 = vld [vmem:[#allocation2 + $0x548] ss:$16 sps:$4 sm:$0xff]   ;;  %v2941_v19 = vld [vmem:[%s3486_s3 + $0x74] ss:$8 sps:$4 sm:$0xff]  }
  0xb6   :  { %1503 = vmatprep.subr.bf16.mxu1 %v2842_v18  ;;  %v2927_v16 = vld [vmem:[#allocation2 + $0x308] ss:$16 sps:$4 sm:$0xff]   ;;  %v2932_v18 = vld [vmem:[#allocation2 + $0x52c] ss:$16 sps:$4 sm:$0xff]  }
  0xb8   :  { %1517 = vmatpush1.bf16.msra.mxu0 %v2843_v21  ;;  %v2939_v21 = vld [vmem:[%s3486_s3 + $0x70] ss:$8 sps:$4 sm:$0xff]  }
  0xb9   :  { %1504 = vmatpush2.bf16.msra.mxu1 %v2840_v20  ;;  %1518 = vmatprep.subr.bf16.mxu0 %v2851_v23  ;;  %v2930_v20 = vld [vmem:[#allocation2 + $0x528] ss:$16 sps:$4 sm:$0xff]   ;;  %v2944_v23 = vld [vmem:[%s3486_s3 + $0x64] ss:$8 sps:$4 sm:$0xff]  }
  0xba   :  { %1555 = vmatprep.subr.bf16.mxu1 %v2848_v22  ;;  %v2935_v22 = vld [vmem:[#allocation2 + $0x50c] ss:$16 sps:$4 sm:$0xff]  }
  0xbc   :  { %1506 = vmatmul.mubr.bf16.vlgmr.msra.gmra.mxu1 %v3233_v6  ;;  %1519 = vmatpush1.bf16.msra.mxu0 %v2849_v25  ;;  %v2867_v6 = vld [vmem:[#allocation2 + $0x248] ss:$16 sps:$4 sm:$0xff]  }
  0xbd   :  { %1556 = vmatpush1.bf16.msra.mxu1 %v2846_v24  ;;  %1520 = vmatprep.subr.bf16.mxu0 %v2857_v27  ;;  %v2933_v24 = vld [vmem:[#allocation2 + $0x508] ss:$16 sps:$4 sm:$0xff]   ;;  %v2947_v27 = vld [vmem:[%s3486_s3 + $0x54] ss:$8 sps:$4 sm:$0xff]  }
  0xbe   :  { %1557 = vmatprep.subr.bf16.mxu1 %v2854_v26  ;;  %1587 = vmatprep.mubr.bf16.mxu1 %v3255_v33  ;;  %v2878_v33 = vld [vmem:[#allocation2 + $0x44c] ss:$16 sps:$4 sm:$0xff]   ;;  %v2942_v25 = vld [vmem:[%s3486_s3 + $0x60] ss:$8 sps:$4 sm:$0xff]  }
  0xbf   :  { %v2938_v26 = vld [vmem:[#allocation2 + $0x60c] ss:$16 sps:$4 sm:$0xff]  }
  0xc0   :  { %1521 = vmatpush1.bf16.msra.mxu0 %v2855_v29  ;;  %v2950_v29 = vld [vmem:[%s3486_s3 + $0x44] ss:$8 sps:$4 sm:$0xff]  }
  0xc1   :  { %1558 = vmatpush1.bf16.msra.mxu1 %v2852_v28  ;;  %1522 = vmatprep.subr.bf16.mxu0 %v2863_v31  ;;  %v2936_v28 = vld [vmem:[#allocation2 + $0x608] ss:$16 sps:$4 sm:$0xff]   ;;  %v2953_v31 = vld [vmem:[%s3486_s3 + $0x34] ss:$8 sps:$4 sm:$0xff]  }
  0xc2   :  { %1559 = vmatprep.subr.bf16.mxu1 %v2860_v30  ;;  %v2948_v30 = vld [vmem:[%s3486_s3 + $0x40] ss:$8 sps:$4 sm:$0xff]  }
  0xc4   :  { %1523 = vmatpush1.bf16.msra.mxu0 %v2861_v51  ;;  %v2956_v51 = vld [vmem:[%s3486_s3 + $0x24] ss:$8 sps:$4 sm:$0xff]  }
  0xc5   :  { %1560 = vmatpush1.bf16.msra.mxu1 %v2858_v32  ;;  %1524 = vmatprep.subr.bf16.mxu0 %v2869_v35  ;;  %v2951_v32 = vld [vmem:[%s3486_s3 + $0x30] ss:$8 sps:$4 sm:$0xff]   ;;  %v2990_v35 = vld [vmem:[%s3486_s3 + $0x160] ss:$8 sps:$4 sm:$0xff]  }
  0xc6   :  { %1561 = vmatprep.subr.bf16.mxu1 %v2866_v34  ;;  %v2992_v34 = vld [vmem:[%s3486_s3 + $0x164] ss:$8 sps:$4 sm:$0xff]  }
  0xc8   :  { %1525 = vmatpush1.bf16.msra.mxu0 %v2867_v6  ;;  %v2995_v6 = vld [vmem:[%s3486_s3 + $0x154] ss:$8 sps:$4 sm:$0xff]  }
  0xc9   :  { %1562 = vmatpush1.bf16.msra.mxu1 %v2864_v36  ;;  %1526 = vmatprep.subr.bf16.mxu0 %v2875_v38  ;;  %v2954_v36 = vld [vmem:[%s3486_s3 + $0x20] ss:$8 sps:$4 sm:$0xff]   ;;  %v2957_v38 = vld [vmem:[%s3486_s3 + $0x10] ss:$8 sps:$4 sm:$0xff]  }
  0xca   :  { %1563 = vmatprep.subr.bf16.mxu1 %v2872_v37  ;;  %v2993_v37 = vld [vmem:[%s3486_s3 + $0x150] ss:$8 sps:$4 sm:$0xff]  }
  0xcc   :  { %1527 = vmatpush1.bf16.msra.mxu0 %v2873_v40  ;;  %v2962_v40 = vld [vmem:[%s3486_s3 + $0x4] ss:$8 sps:$4 sm:$0xff]  }
  0xcd   :  { %1564 = vmatpush1.bf16.msra.mxu1 %v2870_v39  ;;  %1528 = vmatprep.subr.bf16.mxu0 %v2881_v41  ;;  %v2998_v39 = vld [vmem:[%s3486_s3 + $0x144] ss:$8 sps:$4 sm:$0xff]   ;;  %v2960_v41 = vld [vmem:[%s3486_s3] ss:$8 sps:$4 sm:$0xff]  }
  0xce   :  { %1565 = vmatprep.subr.bf16.mxu1 %v2878_v33  ;;  %v2996_v33 = vld [vmem:[%s3486_s3 + $0x140] ss:$8 sps:$4 sm:$0xff]  }
  0xd0   :  { %1529 = vmatpush1.bf16.msra.mxu0 %v2879_v43  ;;  %v2965_v43 = vld [vmem:[%s3486_s3 + $0xf4] ss:$8 sps:$4 sm:$0xff]  }
  0xd1   :  { %1566 = vmatpush1.bf16.msra.mxu1 %v2876_v42  ;;  %1530 = vmatprep.subr.bf16.mxu0 %v2887_v45  ;;  %v3001_v42 = vld [vmem:[%s3486_s3 + $0x134] ss:$8 sps:$4 sm:$0xff]   ;;  %v2963_v45 = vld [vmem:[%s3486_s3 + $0xf0] ss:$8 sps:$4 sm:$0xff]  }
  0xd2   :  { %1567 = vmatprep.subr.bf16.mxu1 %v2884_v44  ;;  %v2999_v44 = vld [vmem:[%s3486_s3 + $0x130] ss:$8 sps:$4 sm:$0xff]  }
  0xd4   :  { %1531 = vmatpush2.bf16.msra.mxu0 %v2885_v47  ;;  %v2968_v47 = vld [vmem:[%s3486_s3 + $0xe4] ss:$8 sps:$4 sm:$0xff]  }
  0xd5   :  { %1568 = vmatpush1.bf16.msra.mxu1 %v2882_v46  ;;  %1532 = vmatprep.subr.bf16.mxu0 %v2893_v49  ;;  %v3004_v46 = vld [vmem:[%s3486_s3 + $0x124] ss:$8 sps:$4 sm:$0xff]   ;;  %v2966_v49 = vld [vmem:[%s3486_s3 + $0xe0] ss:$8 sps:$4 sm:$0xff]  }
  0xd6   :  { %1569 = vmatprep.subr.bf16.mxu1 %v2890_v48  ;;  %v3002_v48 = vld [vmem:[%s3486_s3 + $0x120] ss:$8 sps:$4 sm:$0xff]  }
  0xd8   :  { %1533 = vmatpush2.bf16.msra.mxu0 %v2891_v52  ;;  %v2971_v52 = vld [vmem:[%s3486_s3 + $0xd4] ss:$8 sps:$4 sm:$0xff]  }
  0xd9   :  { %1570 = vmatpush1.bf16.msra.mxu1 %v2888_v50  ;;  %1534 = vmatprep.subr.bf16.mxu0 %v2899_v54  ;;  %v3007_v50 = vld [vmem:[%s3486_s3 + $0x114] ss:$8 sps:$4 sm:$0xff]   ;;  %v2969_v54 = vld [vmem:[%s3486_s3 + $0xd0] ss:$8 sps:$4 sm:$0xff]  }
  0xda   :  { %1571 = vmatprep.subr.bf16.mxu1 %v2896_v53  ;;  %v3005_v53 = vld [vmem:[%s3486_s3 + $0x110] ss:$8 sps:$4 sm:$0xff]  }
  0xdc   :  { %1535 = vmatpush2.bf16.msra.mxu0 %v2897_v56  ;;  %v2974_v56 = vld [vmem:[%s3486_s3 + $0xc4] ss:$8 sps:$4 sm:$0xff]  }
  0xdd   :  { %1572 = vmatpush2.bf16.msra.mxu1 %v2894_v55  ;;  %1536 = vmatprep.subr.bf16.mxu0 %v2905_v58  ;;  %v3010_v55 = vld [vmem:[%s3486_s3 + $0x104] ss:$8 sps:$4 sm:$0xff]   ;;  %v2972_v58 = vld [vmem:[%s3486_s3 + $0xc0] ss:$8 sps:$4 sm:$0xff]  }
  0xde   :  { %1573 = vmatprep.subr.bf16.mxu1 %v2902_v57  ;;  %v3008_v57 = vld [vmem:[%s3486_s3 + $0x100] ss:$8 sps:$4 sm:$0xff]  }
  0xe0   :  { %1537 = vmatpush2.bf16.msra.mxu0 %v2903_v60  ;;  %v2977_v60 = vld [vmem:[%s3486_s3 + $0xb4] ss:$8 sps:$4 sm:$0xff]  }
  0xe1   :  { %1574 = vmatpush2.bf16.msra.mxu1 %v2900_v59  ;;  %1538 = vmatprep.subr.bf16.mxu0 %v2911_v62  ;;  %v3013_v59 = vld [vmem:[%s3486_s3 + $0x1f4] ss:$8 sps:$4 sm:$0xff]   ;;  %v2975_v62 = vld [vmem:[%s3486_s3 + $0xb0] ss:$8 sps:$4 sm:$0xff]  }
  0xe2   :  { %1575 = vmatprep.subr.bf16.mxu1 %v2908_v61  ;;  %v3011_v61 = vld [vmem:[%s3486_s3 + $0x1f0] ss:$8 sps:$4 sm:$0xff]  }
  0xe4   :  { %1539 = vmatpush2.bf16.msra.mxu0 %v2909_v0  ;;  %v2980_v0 = vld [vmem:[%s3486_s3 + $0xa4] ss:$8 sps:$4 sm:$0xff]  }
  0xe5   :  { %1576 = vmatpush2.bf16.msra.mxu1 %v2906_v63  ;;  %1540 = vmatprep.subr.bf16.mxu0 %v2917_v2  ;;  %v3016_v63 = vld [vmem:[%s3486_s3 + $0x1e4] ss:$8 sps:$4 sm:$0xff]   ;;  %v2978_v2 = vld [vmem:[%s3486_s3 + $0xa0] ss:$8 sps:$4 sm:$0xff]  }
  0xe6   :  { %1577 = vmatprep.subr.bf16.mxu1 %v2914_v1  ;;  %v3014_v1 = vld [vmem:[%s3486_s3 + $0x1e0] ss:$8 sps:$4 sm:$0xff]  }
  0xe8   :  { %1541 = vmatpush2.bf16.msra.mxu0 %v2915_v4  ;;  %v2981_v4 = vld [vmem:[%s3486_s3 + $0x90] ss:$8 sps:$4 sm:$0xff]  }
  0xe9   :  { %1578 = vmatpush2.bf16.msra.mxu1 %v2912_v3  ;;  %1542 = vmatprep.subr.bf16.mxu0 %v2923_v8  ;;  %v2983_v3 = vld [vmem:[%s3486_s3 + $0x94] ss:$8 sps:$4 sm:$0xff]   ;;  %v2984_v8 = vld [vmem:[%s3486_s3 + $0x80] ss:$8 sps:$4 sm:$0xff]  }
  0xea   :  { %1579 = vmatprep.subr.bf16.mxu1 %v2920_v5  ;;  %v2986_v5 = vld [vmem:[%s3486_s3 + $0x84] ss:$8 sps:$4 sm:$0xff]  }
  0xec   :  { %1543 = vmatpush2.bf16.msra.mxu0 %v2921_v10 }
  0xed   :  { %1580 = vmatpush2.bf16.msra.mxu1 %v2918_v9  ;;  %1544 = vmatprep.subr.bf16.mxu0 %v2929_v12  ;;  %v3017_v12 = vld [vmem:[%s3486_s3 + $0x1d0] ss:$8 sps:$4 sm:$0xff]  }
  0xee   :  { %1581 = vmatprep.subr.bf16.mxu1 %v2926_v11  ;;  %v3019_v11 = vld [vmem:[%s3486_s3 + $0x1d4] ss:$8 sps:$4 sm:$0xff]  }
  0xf0   :  { %1545 = vmatpush2.bf16.msra.mxu0 %v2927_v16 }
  0xf1   :  { %1582 = vmatpush2.bf16.msra.mxu1 %v2924_v15  ;;  %2041 = vmatprep.subr.bf16.mxu0 %v2941_v19  ;;  %v3022_v19 = vld [vmem:[%s3486_s3 + $0x1c4] ss:$8 sps:$4 sm:$0xff]  }
  0xf2   :  { %1583 = vmatprep.subr.bf16.mxu1 %v2932_v18  ;;  %v3020_v18 = vld [vmem:[%s3486_s3 + $0x1c0] ss:$8 sps:$4 sm:$0xff]  }
  0xf3   :  { %1547 = vmatmul.mubr.bf16.vlgmr.msra.gmra.mxu0 %v3235_v7  ;;  %v2945_v7 = vld [vmem:[%s3486_s3 + $0x50] ss:$8 sps:$4 sm:$0xff]  }
  0xf4   :  { %2042 = vmatpush1.bf16.msra.mxu0 %v2939_v21 }
  0xf5   :  { %1584 = vmatpush2.bf16.msra.mxu1 %v2930_v20  ;;  %2043 = vmatprep.subr.bf16.mxu0 %v2944_v23 }
  0xf6   :  { %1585 = vmatprep.subr.bf16.mxu1 %v2935_v22 }
  0xf8   :  { %2044 = vmatpush1.bf16.msra.mxu0 %v2942_v25  ;;  %v3025_v25 = vld [vmem:[%s3486_s3 + $0x1b4] ss:$8 sps:$4 sm:$0xff]  }
  0xf9   :  { %1586 = vmatpush2.bf16.msra.mxu1 %v2933_v24  ;;  %2045 = vmatprep.subr.bf16.mxu0 %v2947_v27 }
  0xfa   :  { %1610 = vmatprep.subr.bf16.mxu1 %v2938_v26  ;;  %v3023_v26 = vld [vmem:[%s3486_s3 + $0x1b0] ss:$8 sps:$4 sm:$0xff]  }
  0xfc   :  { %1588 = vmatmul.mubr.bf16.vlgmr.msra.gmra.mxu1 %v3260_v14  ;;  %2046 = vmatpush1.bf16.msra.mxu0 %v2945_v7  ;;  %v2987_v14 = vld [vmem:[%s3486_s3 + $0x170] ss:$8 sps:$4 sm:$0xff]   ;;  %v3028_v7 = vld [vmem:[%s3486_s3 + $0x1a4] ss:$8 sps:$4 sm:$0xff]  }
  0xfd   :  { %1611 = vmatpush1.bf16.msra.mxu1 %v2936_v28  ;;  %1628 = vmatprep.mubr.bf16.mxu1 %v3167_v13  ;;  %v2989_v13 = vld [vmem:[%s3486_s3 + $0x174] ss:$8 sps:$4 sm:$0xff]  }
  0xfe   :  { %2047 = vmatprep.subr.bf16.mxu0 %v2950_v29  ;;  %2082 = vmatprep.subr.bf16.mxu1 %v2989_v13  ;;  %v3026_v29 = vld [vmem:[%s3486_s3 + $0x1a0] ss:$8 sps:$4 sm:$0xff]  }
  0xff   :  { %v3032_v13 = vld [vmem:[%s3486_s3 + $0x180] ss:$8 sps:$4 sm:$0xff]  }
 0x100   :  { %2048 = vmatpush1.bf16.msra.mxu0 %v2948_v30 }
 0x101   :  { %2049 = vmatprep.subr.bf16.mxu0 %v2953_v31  ;;  %v3031_v31 = vld [vmem:[%s3486_s3 + $0x194] ss:$8 sps:$4 sm:$0xff]  }
 0x104   :  { %2524 = vmatmul.mubr.msk.bf16.vlgmr.msra.gmra.mxu1 %vm1305_vm0, %v3243_v17  ;;  %2050 = vmatpush1.bf16.msra.mxu0 %v2951_v32  ;;  %v2959_v17 = vld [vmem:[%s3486_s3 + $0x14] ss:$8 sps:$4 sm:$0xff]   ;;  %v3029_v32 = vld [vmem:[%s3486_s3 + $0x190] ss:$8 sps:$4 sm:$0xff]  }
 0x105   :  { %2083 = vmatpush1.bf16.msra.mxu1 %v2987_v14  ;;  %2051 = vmatprep.subr.bf16.mxu0 %v2956_v51  ;;  %v3034_v14 = vld [vmem:[%s3486_s3 + $0x184] ss:$8 sps:$4 sm:$0xff]   ;;  %v281_v51 = vlaneseq }
 0x106   :  { %2084 = vmatprep.subr.bf16.mxu1 %v2992_v34 }
 0x107   :  { %v3463_v34 = vshrl.u32 %v281_v51, 7  ;;  %v3044_v51 = vld [vmem:[#allocation8 + $0x18] sm:$0xff]  }
 0x108   :  { %2052 = vmatpush1.bf16.msra.mxu0 %v2954_v36  ;;  %v279_v36 = vld [vmem:[#allocation5] sm:$0xf] }
 0x109   :  { %2085 = vmatpush1.bf16.msra.mxu1 %v2990_v35  ;;  %2053 = vmatprep.subr.bf16.mxu0 %v2959_v17  ;;  %v283_v35 = vsub.s32 0, %v3463_v34 }
 0x10a   :  { %2086 = vmatprep.subr.bf16.mxu1 %v2995_v6  ;;  %v287_v6 = vsub.s32 1, %v3463_v34 }
 0x10b   :  { %v284_v17 = vrot.slane %v279_v36, %v283_v35 }
 0x10c   :  { %2054 = vmatpush1.bf16.msra.mxu0 %v2957_v38 }
 0x10d   :  { %2087 = vmatpush1.bf16.msra.mxu1 %v2993_v37  ;;  %2055 = vmatprep.subr.bf16.mxu0 %v2962_v40  ;;  %v288_v37 = vrot.slane %v279_v36, %v287_v6 }
 0x10e   :  { %2088 = vmatprep.subr.bf16.mxu1 %v2998_v39 }
 0x110   :  { %2056 = vmatpush1.bf16.msra.mxu0 %v2960_v41 }
 0x111   :  { %2089 = vmatpush1.bf16.msra.mxu1 %v2996_v33  ;;  %2057 = vmatprep.subr.bf16.mxu0 %v2965_v43 }
 0x112   :  { %2090 = vmatprep.subr.bf16.mxu1 %v3001_v42 }
 0x114   :  { %2058 = vmatpush2.bf16.msra.mxu0 %v2963_v45 }
 0x115   :  { %2091 = vmatpush1.bf16.msra.mxu1 %v2999_v44  ;;  %2059 = vmatprep.subr.bf16.mxu0 %v2968_v47 }
 0x116   :  { %2092 = vmatprep.subr.bf16.mxu1 %v3004_v46 }
 0x118   :  { %2060 = vmatpush2.bf16.msra.mxu0 %v2966_v49 }
 0x119   :  { %2093 = vmatpush1.bf16.msra.mxu1 %v3002_v48  ;;  %2061 = vmatprep.subr.bf16.mxu0 %v2971_v52 }
 0x11a   :  { %2094 = vmatprep.subr.bf16.mxu1 %v3007_v50 }
 0x11c   :  { %2062 = vmatpush2.bf16.msra.mxu0 %v2969_v54 }
 0x11d   :  { %2095 = vmatpush1.bf16.msra.mxu1 %v3005_v53  ;;  %2063 = vmatprep.subr.bf16.mxu0 %v2974_v56 }
 0x11e   :  { %2096 = vmatprep.subr.bf16.mxu1 %v3010_v55 }
 0x120   :  { %2064 = vmatpush2.bf16.msra.mxu0 %v2972_v58 }
 0x121   :  { %2097 = vmatpush1.bf16.msra.mxu1 %v3008_v57  ;;  %2065 = vmatprep.subr.bf16.mxu0 %v2977_v60  ;;  %v291_v60 = vsub.s32 2, %v3463_v34 }
 0x122   :  { %2098 = vmatprep.subr.bf16.mxu1 %v3013_v59 }
 0x124   :  { %2066 = vmatpush2.bf16.msra.mxu0 %v2975_v62  ;;  %v295_v62 = vsub.s32 3, %v3463_v34  ;;  %v2589_v34 = vld [vmem:[%s3489_s6] ss:$0 sm:$0xff] }
 0x125   :  { %2099 = vmatpush2.bf16.msra.mxu1 %v3011_v61  ;;  %2067 = vmatprep.subr.bf16.mxu0 %v2980_v0  ;;  %v292_v0 = vrot.slane %v279_v36, %v291_v60 }
 0x126   :  { %2100 = vmatprep.subr.bf16.mxu1 %v3016_v63 }
 0x128   :  { %2068 = vmatpush2.bf16.msra.mxu0 %v2978_v2  ;;  %v296_v2 = vrot.slane %v279_v36, %v295_v62  ;;  %v3045_v36 = vld [vmem:[#allocation8 + $0x50] sm:$0xff]  }
 0x129   :  { %2101 = vmatpush2.bf16.msra.mxu1 %v3014_v1  ;;  %2069 = vmatprep.subr.bf16.mxu0 %v2983_v3 }
 0x12a   :  { %2102 = vmatprep.subr.bf16.mxu1 %v3019_v11 }
 0x12c   :  { %2070 = vmatpush2.bf16.msra.mxu0 %v2981_v4 }
 0x12d   :  { %2071 = vmatprep.subr.bf16.mxu0 %v2986_v5  ;;  %2103 = vmatpush2.bf16.msra.mxu1 %v3017_v12 }
 0x12e   :  { %2104 = vmatprep.subr.bf16.mxu1 %v3022_v19 }
 0x130   :  { %2072 = vmatpush2.bf16.msra.mxu0 %v2984_v8 }
 0x131   :  { %2105 = vmatpush2.bf16.msra.mxu1 %v3020_v18 }
 0x132   :  { %2106 = vmatprep.subr.bf16.mxu1 %v3025_v25 }
 0x133   :  { %v1343_v9 = vpop.f32.mrf.mxu0 }
 0x134   :  { %v1384_v10 = vpop.f32.mrf.mxu1  ;;  %v1344_v38 = vadd.f32 %v1343_v9, %v284_v17  ;;  %v3046_v17 = vld [vmem:[#allocation8 + $0x10] sm:$0xff]  }
 0x135   :  { %v1345_v15 = vpop.f32.mrf.mxu0  ;;  %2107 = vmatpush2.bf16.msra.mxu1 %v3023_v26 }
 0x136   :  { %v1386_v16 = vpop.f32.mrf.mxu1  ;;  %2108 = vmatprep.subr.bf16.mxu1 %v3028_v7  ;;  %v1346_v39 = vadd.f32 %v1345_v15, %v288_v37  ;;  %v1385_v40 = vadd.f32 %v1384_v10, %v1344_v38  ;;  %v3039_v7 = vld [vmem:[#allocation8 + $0x68] sm:$0xff]  }
 0x137   :  { %v1347_v21 = vpop.f32.mrf.mxu0  ;;  %v3047_v37 = vld [vmem:[#allocation8 + $0x48] sm:$0xff]  }
 0x138   :  { %v1388_v20 = vpop.f32.mrf.mxu1  ;;  %v1387_v41 = vadd.f32 %v1386_v16, %v1346_v39  ;;  %v3036_v21 = vld [vmem:[#allocation8 + $0x38] sm:$0xff]   ;;  %v3048_v38 = vld [vmem:[#allocation8 + $0x8] sm:$0xff]   ;;  %v3049_v39 = vld [vmem:[#allocation8 + $0x40] sm:$0xff]  }
 0x139   :  { %v1348_v23 = vpop.f32.mrf.mxu0  ;;  %2109 = vmatpush2.bf16.msra.mxu1 %v3026_v29  ;;  %v3035_v20 = vld [vmem:[#allocation8 + $0x78] sm:$0xff]  }
 0x13a   :  { %v1389_v22 = vpop.f32.mrf.mxu1  ;;  %2110 = vmatprep.subr.bf16.mxu1 %v3031_v31  ;;  %2606 = vmatprep.subr.bf16.mxu0 %v3035_v20  ;;  %v3040_v31 = vld [vmem:[#allocation8 + $0x28] sm:$0xff]  }
 0x13b   :  { %v3037_v22 = vld [vmem:[#allocation8 + $0x70] sm:$0xff]  }
 0x13c   :  { %v1466_v24 = vpop.f32.mrf.mxu1 }
 0x13d   :  { %2111 = vmatpush2.bf16.msra.mxu1 %v3029_v32  ;;  %v3041_v32 = vld [vmem:[#allocation8 + $0x60] sm:$0xff]  }
 0x13e   :  { %v1468_v27 = vpop.f32.mrf.mxu1  ;;  %2112 = vmatprep.subr.bf16.mxu1 %v3034_v14  ;;  %v3042_v14 = vld [vmem:[#allocation8 + $0x20] sm:$0xff]  }
 0x140   :  { %v1470_v28 = vpop.f32.mrf.mxu1 }
 0x141   :  { %2113 = vmatpush2.bf16.msra.mxu1 %v3032_v13  ;;  %v3043_v13 = vld [vmem:[#allocation8 + $0x58] sm:$0xff]  }
 0x142   :  { %v1471_v30 = vpop.f32.mrf.mxu1 }
 0x173   :  { %v1425_v33 = vpop.f32.mrf.mxu0 }
 0x174   :  { %v1426_v42 = vadd.f32 %v1425_v33, %v1385_v40  ;;  %v3050_v40 = vld [vmem:[#allocation8] sm:$0xff]  }
 0x175   :  { %v1427_v43 = vpop.f32.mrf.mxu0 }
 0x176   :  { %v1467_v44 = vadd.f32 %v1466_v24, %v1426_v42  ;;  %v1428_v45 = vadd.f32 %v1427_v43, %v1387_v41 }
 0x177   :  { %v1429_v46 = vpop.f32.mrf.mxu0 }
 0x178   :  { %v1469_v47 = vadd.f32 %v1468_v27, %v1428_v45  ;;  %v1637_v48 = vmax.f32 %v1467_v44, 0.0  ;;  %v3038_v27 = vld [vmem:[#allocation8 + $0x30] sm:$0xff]   ;;  %v1709_v44 = vld [vmem:[#allocation7] sm:$0x3] }
 0x179   :  { %v1430_v49 = vpop.f32.mrf.mxu0  ;;  %v1714_v45 = vrot.slane %v1709_v44, %v283_v35  ;;  %v1718_v46 = vrot.slane %v1709_v44, %v287_v6 }
 0x17a   :  { %v1638_v50 = vmax.f32 %v1469_v47, 0.0  ;;  %v1641_v54 = vpack.c.bf16 %v1637_v48, %v1637_v48 }
 0x17c   :  { %v1507_v52 = vpop.f32.mrf.mxu1  ;;  %v1642_v53 = vpack.c.bf16 %v1638_v50, %v1638_v50 }
 0x17d   :  { %v1508_v4 = vadd.f32 %v1507_v52, %v292_v0 }
 0x17e   :  { %v1509_v55 = vpop.f32.mrf.mxu1  ;;  %2073 = vmatprep.mubr.bf16.mxu0 %v1642_v53 }
 0x17f   :  { %2074 = vmatmul.mubr.bf16.vlgmr.msra.gmra.mxu0 %v1641_v54  ;;  %v1510_v8 = vadd.f32 %v1509_v55, %v296_v2 }
 0x180   :  { %v1511_v56 = vpop.f32.mrf.mxu1  ;;  %2607 = vmatpush3.bf16.msra.mxu0 %v3036_v21 }
 0x181   :  { %2608 = vmatprep.subr.bf16.mxu0 %v3037_v22 }
 0x182   :  { %v1512_v57 = vpop.f32.mrf.mxu1 }
 0x184   :  { %2609 = vmatpush3.bf16.msra.mxu0 %v3038_v27 }
 0x185   :  { %2610 = vmatprep.subr.bf16.mxu0 %v3039_v7 }
 0x188   :  { %2611 = vmatpush3.bf16.msra.mxu0 %v3040_v31 }
 0x189   :  { %2612 = vmatprep.subr.bf16.mxu0 %v3041_v32 }
 0x18c   :  { %2613 = vmatpush3.bf16.msra.mxu0 %v3042_v14 }
 0x18d   :  { %2614 = vmatprep.subr.bf16.mxu0 %v3043_v13 }
 0x190   :  { %2615 = vmatpush3.bf16.msra.mxu0 %v3044_v51 }
 0x191   :  { %2616 = vmatprep.subr.bf16.mxu0 %v3045_v36 }
 0x194   :  { %2617 = vmatpush3.bf16.msra.mxu0 %v3046_v17 }
 0x195   :  { %2618 = vmatprep.subr.bf16.mxu0 %v3047_v37 }
 0x198   :  { %2619 = vmatpush3.bf16.msra.mxu0 %v3048_v38 }
 0x199   :  { %2620 = vmatprep.subr.bf16.mxu0 %v3049_v39 }
 0x19c   :  { %2621 = vmatpush3.bf16.msra.mxu0 %v3050_v40 }
 0x1b3   :  { %v1548_v58 = vpop.f32.mrf.mxu0 }
 0x1b4   :  { %v1549_v9 = vadd.f32 %v1548_v58, %v1508_v4 }
 0x1b5   :  { %v1550_v59 = vpop.f32.mrf.mxu0 }
 0x1b6   :  { %v1551_v11 = vadd.f32 %v1550_v59, %v1510_v8 }
 0x1b7   :  { %v1552_v61 = vpop.f32.mrf.mxu0 }
 0x1b9   :  { %v1553_v63 = vpop.f32.mrf.mxu0 }
 0x1bc   :  { %v1589_v1 = vpop.f32.mrf.mxu1 }
 0x1bd   :  { %v1590_v12 = vadd.f32 %v1589_v1, %v1549_v9 }
 0x1be   :  { %v1591_v3 = vpop.f32.mrf.mxu1 }
 0x1bf   :  { %v1592_v16 = vadd.f32 %v1591_v3, %v1551_v11 }
 0x1c0   :  { %v1593_v5 = vpop.f32.mrf.mxu1 }
 0x1c2   :  { %v1594_v10 = vpop.f32.mrf.mxu1 }
 0x1c4   :  { %v1630_v15 = vpop.f32.mrf.mxu1 }
 0x1c5   :  { %v1631_v18 = vadd.f32 %v1630_v15, %v1590_v12 }
 0x1c6   :  { %v1632_v19 = vpop.f32.mrf.mxu1 }
 0x1c7   :  { %v1633_v23 = vadd.f32 %v1632_v19, %v1592_v16  ;;  %v1639_v24 = vmax.f32 %v1631_v18, 0.0 }
 0x1c8   :  { %v1634_v25 = vpop.f32.mrf.mxu1 }
 0x1c9   :  { %v1640_v26 = vmax.f32 %v1633_v23, 0.0  ;;  %v1643_v30 = vpack.c.bf16 %v1639_v24, %v1639_v24 }
 0x1ca   :  { %v1635_v28 = vpop.f32.mrf.mxu1 }
 0x1cb   :  { %v1644_v29 = vpack.c.bf16 %v1640_v26, %v1640_v26 }
 0x1cd   :  { %2114 = vmatprep.mubr.bf16.mxu1 %v1644_v29 }
 0x1ce   :  { %2115 = vmatmul.mubr.bf16.vlgmr.msra.gmra.mxu1 %v1643_v30 }
 0x23f   :  { %v2075_v33 = vpop.f32.mrf.mxu0 }
 0x240   :  { %v2076_v47 = vadd.f32 %v2075_v33, %v1714_v45 }
 0x241   :  { %v2077_v41 = vpop.f32.mrf.mxu0 }
 0x242   :  { %v2078_v49 = vadd.f32 %v2077_v41, %v1718_v46 }
 0x243   :  { %v2079_v42 = vpop.f32.mrf.mxu0 }
 0x245   :  { %v2080_v43 = vpop.f32.mrf.mxu0 }
 0x28e   :  { %v2116_v48 = vpop.f32.mrf.mxu1 }
 0x28f   :  { %v2117_v50 = vadd.f32 %v2116_v48, %v2076_v47 }
 0x290   :  { %v2118_v52 = vpop.f32.mrf.mxu1 }
 0x291   :  { %v2119_v53 = vadd.f32 %v2118_v52, %v2078_v49  ;;  %v2123_v54 = vmax.f32 %v2117_v50, 0.0 }
 0x292   :  { %v2120_v55 = vpop.f32.mrf.mxu1 }
 0x293   :  { %v2124_v56 = vmax.f32 %v2119_v53, 0.0  ;;  %v2125_v59 = vpack.c.bf16 %v2123_v54, %v2123_v54 }
 0x294   :  { %v2121_v57 = vpop.f32.mrf.mxu1 }
 0x295   :  { %v2126_v58 = vpack.c.bf16 %v2124_v56, %v2124_v56 }
 0x297   :  { %2294 = vmatprep.mubr.bf16.mxu0 %v2126_v58 }
 0x298   :  { %2295 = vmatmul.mubr.bf16.vlgmr.msra.gmra.mxu0 %v2125_v59 }
 0x358   :  { %v2622_v60 = vpop.f32.mrf.mxu0 }
 0x35a   :  { %v2623_v35 = vpop.f32.mrf.mxu0 }
 0x35b   :  { %v2624_v6 = vadd.f32 %v2623_v35, %v2622_v60 }
 0x35c   :  { %v2625_v61 = vpop.f32.mrf.mxu0 }
 0x35d   :  { %v2297_v62 = vadd.f32 %v2624_v6, %v2589_v34 }
 0x35e   :  { %v2626_v63 = vpop.f32.mrf.mxu0 }
 0x35f   :  { %2302 = vst [vmem:[#allocation10] sm:$0xff] %v2297_v62 }
 0x360   :  { %3142 = shalt.err (!%p3139_p10)
}
 0x361   :  { %2312 = dma.vmem_to_hbm [thread:$0]  %s2310_s21, 128, %s3490_s7, [#allocation4]  }
 0x362   :  { %3157 = dma.done.wait [#allocation4], 128  }
 0x363   :  { %3158 = vsyncadd [#allocation4], 4294967168 }
 0x364   :  { %2316 = vsyncpa [#allocation3], 1 }
 0x365   :  { %2317 = vsyncpa [#allocation6], 1 }
 0x366   :  { %2318 = vsyncpa [#allocation9], 1 }
 0x367   :  { %2319 = vsyncpa [#allocation4], 1 }

</bundles_post_ra>
